<compile_context>
chip_gen: v6e
topology: v6e:2x2x1
jax: 0.10.0
libtpu: 0.0.40
codegen_flags: <defaults>
</compile_context>

<pallas_src>
import math

import jax
import jax.numpy as jnp
from jax.experimental import pallas as pl
from jax.experimental.pallas import tpu as pltpu


def _round_up(v, m):
    return (v + m - 1) // m * m


# --------------------------------------------------------------------------
# Kernel: base matmul accumulated over K, LoRA correction applied on the
# last K step from a precomputed (tm, rp) x@A.T slab.
# --------------------------------------------------------------------------
def lora_linear_kernel(x_ref, w_ref, b_ref, xa_ref, bt_ref, o_ref, acc_ref):
    # Grid: (i over M tiles, j over N tiles, k over K tiles); k innermost.
    #   x_ref : (tm, tk)   input rows slab
    #   w_ref : (tk, tn)   frozen linear weight, transposed, K/N tiled
    #   b_ref : (1, tn)    frozen linear bias (f32)
    #   xa_ref: (tm, rp)   precomputed x @ A.T (rank padded to 128 lanes)
    #   bt_ref: (rp, tn)   lora_B.T with scaling pre-folded
    #   acc_ref: (tm, tn)  f32 scratch accumulator over K
    k = pl.program_id(2)
    nk = pl.num_programs(2)

    partial = jnp.dot(x_ref[...], w_ref[...], preferred_element_type=jnp.float32)

    @pl.when(k == 0)
    def _first():
        # Write directly (dot + bias): no zero-fill + RMW on the first step.
        acc_ref[...] = partial + b_ref[...]

    @pl.when(k != 0)
    def _accum():
        acc_ref[...] += partial

    @pl.when(k == nk - 1)
    def _finalize():
        lora = jnp.dot(xa_ref[...], bt_ref[...], preferred_element_type=jnp.float32)
        o_ref[...] = (acc_ref[...] + lora).astype(o_ref.dtype)


# --------------------------------------------------------------------------
# One-time frozen-weight preparation (hoist out of the per-call hot path).
# --------------------------------------------------------------------------
def prepare_lora_linear(W, b, A, B, scaling, *, tn=1024, tk=1024,
                        compute_dtype=jnp.float32):
    """W: (out,in), b: (out,), A: (rank,in), B: (out,rank)."""
    N, K = W.shape
    r = A.shape[0]
    lane = 128

    tn_eff = _round_up(min(tn, _round_up(N, lane)), lane)
    tk_eff = _round_up(min(tk, _round_up(K, lane)), lane)
    Np = _round_up(N, tn_eff)
    Kp = _round_up(K, tk_eff)
    rp = _round_up(max(r, 1), lane)  # guard r == 0 (avoid zero-width BlockSpec)

    def pad2(a, s0, s1):
        return jnp.pad(a, ((0, s0 - a.shape[0]), (0, s1 - a.shape[1])))

    wt_p = pad2(W.T, Kp, Np).astype(compute_dtype)
    at_p = pad2(A.T, Kp, rp).astype(compute_dtype)
    # Fold LoRA scaling into B.T once (before any cast).
    bt_p = pad2(B.T * jnp.asarray(scaling, B.dtype), rp, Np).astype(compute_dtype)
    b_p = jnp.pad(b, (0, Np - N)).reshape(1, Np).astype(jnp.float32)

    return dict(wt_p=wt_p, at_p=at_p, bt_p=bt_p, b_p=b_p,
                N=N, K=K, Np=Np, Kp=Kp, rp=rp,
                tn_eff=tn_eff, tk_eff=tk_eff, compute_dtype=compute_dtype)


# --------------------------------------------------------------------------
# Per-call apply (only x-dependent work happens here).
# --------------------------------------------------------------------------
def lora_linear_apply(x, prep, *, tm=512, vmem_limit_bytes=48 * 1024 * 1024):
    orig_shape = x.shape
    K, N = prep["K"], prep["N"]
    assert orig_shape[-1] == K
    out_dtype = x.dtype
    compute_dtype = prep["compute_dtype"]

    x2d = x.reshape(-1, K)
    M = x2d.shape[0]
    if M == 0:
        return jnp.zeros((*orig_shape[:-1], N), out_dtype)

    sub = 16 if compute_dtype == jnp.bfloat16 else 8
    tm_eff = _round_up(min(tm, _round_up(M, sub)), sub)
    Mp = _round_up(M, tm_eff)

    Kp, Np, rp = prep["Kp"], prep["Np"], prep["rp"]
    tk_eff, tn_eff = prep["tk_eff"], prep["tn_eff"]

    x_p = jnp.pad(x2d, ((0, Mp - M), (0, Kp - K))).astype(compute_dtype)

    # Precompute x @ A.T once (skinny (Mp, rp) matmul) instead of re-doing it
    # inside the kernel for every N tile.  HIGHEST precision keeps the f32
    # path bit-faithful; the matmul is tiny relative to the base GEMM.
    xa_p = jnp.dot(x_p, prep["at_p"], preferred_element_type=jnp.float32,
                   precision=jax.lax.Precision.HIGHEST).astype(compute_dtype)

    grid = (Mp // tm_eff, Np // tn_eff, Kp // tk_eff)

    out_p = pl.pallas_call(
        lora_linear_kernel,
        out_shape=jax.ShapeDtypeStruct((Mp, Np), out_dtype),
        grid_spec=pltpu.PrefetchScalarGridSpec(
            num_scalar_prefetch=0,
            grid=grid,
            in_specs=[
                pl.BlockSpec((tm_eff, tk_eff), lambda i, j, k: (i, k)),  # x
                pl.BlockSpec((tk_eff, tn_eff), lambda i, j, k: (k, j)),  # W.T
                pl.BlockSpec((1, tn_eff),      lambda i, j, k: (0, j)),  # bias
                pl.BlockSpec((tm_eff, rp),     lambda i, j, k: (i, 0)),  # x @ A.T
                pl.BlockSpec((rp, tn_eff),     lambda i, j, k: (0, j)),  # scaled B.T
            ],
            out_specs=pl.BlockSpec((tm_eff, tn_eff), lambda i, j, k: (i, j)),
            scratch_shapes=[
                pltpu.VMEM((tm_eff, tn_eff), jnp.float32),  # f32 accumulator
            ],
        ),
        compiler_params=pltpu.CompilerParams(
            dimension_semantics=("parallel", "parallel", "arbitrary"),
            vmem_limit_bytes=vmem_limit_bytes,
        ),
    )(x_p, prep["wt_p"], prep["b_p"], xa_p, prep["bt_p"])

    out2d = out_p[:M, :N]
    return out2d.reshape(*orig_shape[:-1], N)


def lora_linear(x, W, b, A, B, scaling, *, tm=512, tn=1024, tk=1024,
                compute_dtype=None):
    """Convenience one-shot wrapper (prepare + apply). For production, call
    prepare_lora_linear() once at load time and lora_linear_apply() per step."""
    if compute_dtype is None:
        compute_dtype = x.dtype
    prep = prepare_lora_linear(W, b, A, B, scaling, tn=tn, tk=tk,
                               compute_dtype=compute_dtype)
    return lora_linear_apply(x, prep, tm=tm)


if __name__ == "__main__":
    # Small shapes consistent with the module: batch=2, seq=8, hidden=32 -> out=64.
    batch, seq = 2, 8
    in_features, out_features = 32, 64
    rank, alpha = 8, 16
    scaling = alpha / rank

    key = jax.random.PRNGKey(0)
    kx, kw, kb, ka, kB = jax.random.split(key, 5)

    x = jax.random.normal(kx, (batch, seq, in_features), dtype=jnp.float32)

    # Frozen linear params (nn.Linear default init: U(-1/sqrt(in), 1/sqrt(in))).
    bound = 1.0 / math.sqrt(in_features)
    W = jax.random.uniform(kw, (out_features, in_features), minval=-bound, maxval=bound)
    b = jax.random.uniform(kb, (out_features,), minval=-bound, maxval=bound)

    # lora_A: kaiming_uniform_(a=sqrt(5)) -> U(-1/sqrt(in), 1/sqrt(in)).
    A = jax.random.uniform(ka, (rank, in_features), minval=-bound, maxval=bound)
    # NOTE: the module zero-inits lora_B; small nonzero values here so the
    # LoRA path is numerically exercised in this synthetic test.
    B = 0.01 * jax.random.normal(kB, (out_features, rank), dtype=jnp.float32)

    # Pure-JAX reference for correctness.
    ref = x @ W.T + b + scaling * ((x @ A.T) @ B.T)

    # f32 compute path (strict check), prepare hoisted once then applied.
    prep_f32 = prepare_lora_linear(W, b, A, B, scaling, compute_dtype=jnp.float32)
    out = lora_linear_apply(x, prep_f32)
    out = jax.block_until_ready(out)
    assert out.shape == (batch, seq, out_features)
    assert jnp.allclose(out, ref, atol=1e-5, rtol=1e-5), "f32 mismatch vs reference"

    # bf16 compute path (production-style MXU feeding), loose tolerance.
    out_bf16 = lora_linear(x, W, b, A, B, scaling, compute_dtype=jnp.bfloat16)
    out_bf16 = jax.block_until_ready(out_bf16)
    assert jnp.allclose(out_bf16, ref, atol=5e-2, rtol=5e-2), "bf16 mismatch vs reference"

    print("KERNEL_OK")
</pallas_src>

<mosaic_0001>
module attributes {stable_mosaic.version = 11 : i64} {
  func.func @lora_linear_kernel(%arg0: i32, %arg1: i32, %arg2: i32, %arg3: memref<16x128xf32, #tpu.memory_space<vmem>>, %arg4: memref<128x128xf32, #tpu.memory_space<vmem>>, %arg5: memref<1x128xf32, #tpu.memory_space<vmem>>, %arg6: memref<16x128xf32, #tpu.memory_space<vmem>>, %arg7: memref<128x128xf32, #tpu.memory_space<vmem>>, %arg8: memref<16x128xf32, #tpu.memory_space<vmem>>, %arg9: memref<16x128xf32, #tpu.memory_space<vmem>>) attributes {dimension_semantics = [#tpu.dimension_semantics<parallel>, #tpu.dimension_semantics<parallel>, #tpu.dimension_semantics<arbitrary>], iteration_bounds = array<i64: 1, 1, 1>, scalar_prefetch = 0 : i64, scratch_operands = 1 : i64, tpu.core_type = #tpu.core_type<tc>, window_params = [{transform_indices = @transform_0, window_bounds = array<i64: 16, 128>}, {transform_indices = @transform_1, window_bounds = array<i64: 128, 128>}, {transform_indices = @transform_2, window_bounds = array<i64: 1, 128>}, {transform_indices = @transform_3, window_bounds = array<i64: 16, 128>}, {transform_indices = @transform_4, window_bounds = array<i64: 128, 128>}, {transform_indices = @transform_5, window_bounds = array<i64: 16, 128>}]} {
    %c0 = arith.constant 0 : index
    %c0_0 = arith.constant 0 : index
    %0 = vector.load %arg3[%c0, %c0_0] : memref<16x128xf32, #tpu.memory_space<vmem>>, vector<16x128xf32>
    %c0_1 = arith.constant 0 : index
    %c0_2 = arith.constant 0 : index
    %1 = vector.load %arg4[%c0_1, %c0_2] : memref<128x128xf32, #tpu.memory_space<vmem>>, vector<128x128xf32>
    %cst = arith.constant dense<0.000000e+00> : vector<16x128xf32>
    %2 = tpu.matmul %0, %1, %cst {dimension_numbers = #tpu.dot_dimension_numbers<[1], [0], [0], [1], [0, 0, 1, 1], [], []>} : vector<16x128xf32>, vector<128x128xf32>, vector<16x128xf32> -> vector<16x128xf32>
    %c0_i32 = arith.constant 0 : i32
    %3 = arith.cmpi eq, %arg2, %c0_i32 : i32
    %4 = arith.extui %3 : i1 to i32
    %c0_i32_3 = arith.constant 0 : i32
    %5 = arith.cmpi ne, %4, %c0_i32_3 : i32
    scf.if %5 {
      %c0_8 = arith.constant 0 : index
      %c0_9 = arith.constant 0 : index
      %12 = vector.load %arg5[%c0_8, %c0_9] : memref<1x128xf32, #tpu.memory_space<vmem>>, vector<1x128xf32>
      %13 = vector.broadcast %12 : vector<1x128xf32> to vector<16x128xf32>
      %14 = arith.addf %2, %13 : vector<16x128xf32>
      %c0_10 = arith.constant 0 : index
      %c0_11 = arith.constant 0 : index
      %15 = vector.load %arg9[%c0_10, %c0_11] : memref<16x128xf32, #tpu.memory_space<vmem>>, vector<16x128xf32>
      tpu.vector_store %arg9[%c0_10, %c0_11], %14 {strides = array<i32>} : memref<16x128xf32, #tpu.memory_space<vmem>>, vector<16x128xf32>,
    } else {
    }
    %c0_i32_4 = arith.constant 0 : i32
    %6 = arith.cmpi ne, %arg2, %c0_i32_4 : i32
    %7 = arith.extui %6 : i1 to i32
    %c0_i32_5 = arith.constant 0 : i32
    %8 = arith.cmpi ne, %7, %c0_i32_5 : i32
    scf.if %8 {
      %c0_8 = arith.constant 0 : index
      %c0_9 = arith.constant 0 : index
      %12 = vector.load %arg9[%c0_8, %c0_9] : memref<16x128xf32, #tpu.memory_space<vmem>>, vector<16x128xf32>
      %13 = arith.addf %12, %2 : vector<16x128xf32>
      %c0_10 = arith.constant 0 : index
      %c0_11 = arith.constant 0 : index
      %14 = vector.load %arg9[%c0_10, %c0_11] : memref<16x128xf32, #tpu.memory_space<vmem>>, vector<16x128xf32>
      tpu.vector_store %arg9[%c0_10, %c0_11], %13 {strides = array<i32>} : memref<16x128xf32, #tpu.memory_space<vmem>>, vector<16x128xf32>,
    } else {
    }
    %c0_i32_6 = arith.constant 0 : i32
    %9 = arith.cmpi eq, %arg2, %c0_i32_6 : i32
    %10 = arith.extui %9 : i1 to i32
    %c0_i32_7 = arith.constant 0 : i32
    %11 = arith.cmpi ne, %10, %c0_i32_7 : i32
    scf.if %11 {
      %c0_8 = arith.constant 0 : index
      %c0_9 = arith.constant 0 : index
      %12 = vector.load %arg6[%c0_8, %c0_9] : memref<16x128xf32, #tpu.memory_space<vmem>>, vector<16x128xf32>
      %c0_10 = arith.constant 0 : index
      %c0_11 = arith.constant 0 : index
      %13 = vector.load %arg7[%c0_10, %c0_11] : memref<128x128xf32, #tpu.memory_space<vmem>>, vector<128x128xf32>
      %cst_12 = arith.constant dense<0.000000e+00> : vector<16x128xf32>
      %14 = tpu.matmul %12, %13, %cst_12 {dimension_numbers = #tpu.dot_dimension_numbers<[1], [0], [0], [1], [0, 0, 1, 1], [], []>} : vector<16x128xf32>, vector<128x128xf32>, vector<16x128xf32> -> vector<16x128xf32>
      %c0_13 = arith.constant 0 : index
      %c0_14 = arith.constant 0 : index
      %15 = vector.load %arg9[%c0_13, %c0_14] : memref<16x128xf32, #tpu.memory_space<vmem>>, vector<16x128xf32>
      %16 = arith.addf %15, %14 : vector<16x128xf32>
      %c0_15 = arith.constant 0 : index
      %c0_16 = arith.constant 0 : index
      %17 = vector.load %arg8[%c0_15, %c0_16] : memref<16x128xf32, #tpu.memory_space<vmem>>, vector<16x128xf32>
      tpu.vector_store %arg8[%c0_15, %c0_16], %16 {strides = array<i32>} : memref<16x128xf32, #tpu.memory_space<vmem>>, vector<16x128xf32>,
    } else {
    }
    return
  }
  func.func @transform_0(%arg0: i32, %arg1: i32, %arg2: i32) -> (i32, i32) {
    %c0_i32 = arith.constant 0 : i32
    return %arg0, %arg2 : i32, i32
  }
  func.func @transform_1(%arg0: i32, %arg1: i32, %arg2: i32) -> (i32, i32) {
    %c0_i32 = arith.constant 0 : i32
    return %arg2, %arg1 : i32, i32
  }
  func.func @transform_2(%arg0: i32, %arg1: i32, %arg2: i32) -> (i32, i32) {
    %c0_i32 = arith.constant 0 : i32
    %c0_i32_0 = arith.constant 0 : i32
    return %c0_i32, %arg1 : i32, i32
  }
  func.func @transform_3(%arg0: i32, %arg1: i32, %arg2: i32) -> (i32, i32) {
    %c0_i32 = arith.constant 0 : i32
    %c0_i32_0 = arith.constant 0 : i32
    return %arg0, %c0_i32 : i32, i32
  }
  func.func @transform_4(%arg0: i32, %arg1: i32, %arg2: i32) -> (i32, i32) {
    %c0_i32 = arith.constant 0 : i32
    %c0_i32_0 = arith.constant 0 : i32
    return %c0_i32, %arg1 : i32, i32
  }
  func.func @transform_5(%arg0: i32, %arg1: i32, %arg2: i32) -> (i32, i32) {
    %c0_i32 = arith.constant 0 : i32
    return %arg0, %arg1 : i32, i32
  }
}

</mosaic_0001>

<bundles_post_ra>
// kernel: tpu_custom_call.1
= control target key start
LH: loop header
LB: loop body
LE: loop exit
PB: predicated region body
PF: predicated region fallthrough
CT: control target
= control target key end

     0   :  { %10 = vsyncpa [#allocation4], 0  ;;  %s607_s0 = inlined_call_operand.hbm [shape: f32[16,128], index: 0, kind: input, shape index: {}]   ;;  %s608_s1 = inlined_call_operand.hbm [shape: f32[128,128], index: 1, kind: input, shape index: {}]   ;;  %s609_s2 = inlined_call_operand.vmem [shape: f32[1,128], index: 2, kind: input, shape index: {}]   ;;  %s610_s3 = inlined_call_operand.hbm [shape: f32[16,128], index: 3, kind: input, shape index: {}]   ;;  %s611_s4 = inlined_call_operand.hbm [shape: f32[128,128], index: 4, kind: input, shape index: {}]   ;;  %s612_s5 = inlined_call_operand.hbm [shape: f32[16,128], index: 5, kind: output, shape index: {}]  }
   0x1   :  { %11 = vsyncpa [#allocation7], 0 }
   0x2   :  { %12 = vsyncpa [#allocation10], 0 }
   0x3   :  { %13 = vsyncpa [#allocation5], 0  ;;  %s537_s18 = smov [#allocation6]   ;;  %s538_s20 = smov [#allocation3]  }
   0x4   :  { %s31_s19 = sshll.u32 %s537_s18, 4  ;;  %s19_s21 = sshll.u32 %s538_s20, 4  ;;  %s32_s19 = int_to_ptr.vmem [resolvable:$true] %s31_s19  ;;  %s20_s21 = int_to_ptr.vmem [resolvable:$true] %s19_s21 }
   0x5   :  { %s437_s22 = scalar_lea.vmem %s32_s19, 2048  ;;  %p442_p1 = scmp.lt.s32.totalorder %s32_s19, %s32_s19 }
   0x6   :  { %p438_p0 = scmp.ne.s32.totalorder %s32_s19, %s437_s22  ;;  %p443_p2 = scmp.lt.s32.totalorder %s437_s22, %s437_s22 }
   0x8   :  { %p444_p3 = por %p443_p2, %p442_p1 }
   0xa   :  { %p445_p4 = pnand %p444_p3, %p438_p0 }
   0xc   :  { %448 = shalt.err (!%p445_p4)
}
   0xd   :  { %s539_s23 = smov 128   ;;  %s540_s24 = smov 8  }
   0xe   :  { %37 = dma.hbm_to_vmem [thread:$0]  %s608_s1, 2048, %s32_s19, [#allocation7], %s539_s23, %s539_s23, %s540_s24  }
   0xf   :  { %s457_s27 = scalar_lea.vmem %s20_s21, 256  ;;  %p462_p6 = scmp.lt.s32.totalorder %s20_s21, %s20_s21 }
  0x10   :  { %p458_p5 = scmp.ne.s32.totalorder %s20_s21, %s457_s27  ;;  %p463_p7 = scmp.lt.s32.totalorder %s457_s27, %s457_s27 }
  0x12   :  { %p464_p8 = por %p463_p7, %p462_p6 }
  0x14   :  { %p465_p9 = pnand %p464_p8, %p458_p5 }
  0x16   :  { %468 = shalt.err (!%p465_p9)
}
  0x17   :  { %25 = dma.hbm_to_vmem [thread:$0]  %s607_s0, 256, %s20_s21, [#allocation4], %s539_s23, %s539_s23, %s540_s24  }
  0x18   :  { %s541_s30 = smov [#allocation8]   ;;  %s542_s7 = smov [#allocation9]  }
  0x19   :  { %s45_s6 = sshll.u32 %s541_s30, 4  ;;  %s57_s8 = sshll.u32 %s542_s7, 4  ;;  %s46_s6 = int_to_ptr.vmem [resolvable:$true] %s45_s6  ;;  %s58_s8 = int_to_ptr.vmem [resolvable:$true] %s57_s8 }
  0x1a   :  { %s477_s1 = scalar_lea.vmem %s46_s6, 256  ;;  %p482_p11 = scmp.lt.s32.totalorder %s46_s6, %s46_s6 }
  0x1b   :  { %p478_p10 = scmp.ne.s32.totalorder %s46_s6, %s477_s1  ;;  %p483_p12 = scmp.lt.s32.totalorder %s477_s1, %s477_s1 }
  0x1d   :  { %p484_p13 = por %p483_p12, %p482_p11 }
  0x1f   :  { %p485_p0 = pnand %p484_p13, %p478_p10 }
  0x21   :  { %488 = shalt.err (!%p485_p0)
}
  0x22   :  { %51 = dma.hbm_to_vmem [thread:$0]  %s610_s3, 256, %s46_s6, [#allocation7], %s539_s23, %s539_s23, %s540_s24  }
  0x23   :  { %s497_s0 = scalar_lea.vmem %s58_s8, 2048  ;;  %p502_p2 = scmp.lt.s32.totalorder %s58_s8, %s58_s8 }
  0x24   :  { %p498_p1 = scmp.ne.s32.totalorder %s58_s8, %s497_s0  ;;  %p503_p3 = scmp.lt.s32.totalorder %s497_s0, %s497_s0 }
  0x26   :  { %p504_p4 = por %p503_p3, %p502_p2 }
  0x28   :  { %p505_p5 = pnand %p504_p4, %p498_p1 }
  0x2a   :  { %508 = shalt.err (!%p505_p5)
}
  0x2b   :  { %63 = dma.hbm_to_vmem [thread:$0]  %s611_s4, 2048, %s58_s8, [#allocation10], %s539_s23, %s539_s23, %s540_s24  }
  0x2c   :  { %529 = dma.done.wait [#allocation4], 256  }
  0x2d   :  { %530 = vsyncadd [#allocation4], 4294967040 }
  0x2e   :  { %531 = dma.done.wait [#allocation7], 2304  }
  0x2f   :  { %532 = vsyncadd [#allocation7], 4294964992 }
  0x30   :  { %533 = dma.done.wait [#allocation10], 2048  }
  0x31   :  { %534 = vsyncadd [#allocation10], 4294965248  ;;  %v93_v0 = vld [vmem:[#allocation6 + $0x78] sm:$0xff]  ;;  %v214_v1 = vld [vmem:[#allocation9 + $0x78] sm:$0xff]  ;;  %s543_s13 = smov [#allocation11]  }
  0x32   :  { %v92_v2 = vld [vmem:[#allocation6 + $0x70] sm:$0xff]  ;;  %352 = vmatprep.subr.mxu0 %v93_v0  ;;  %387 = vmatprep.subr.mxu1 %v214_v1  ;;  %v213_v3 = vld [vmem:[#allocation9 + $0x70] sm:$0xff]  ;;  %v91_v4 = vld [vmem:[#allocation6 + $0x68] sm:$0xff]  ;;  %s301_s14 = sshll.u32 %s543_s13, 4  ;;  %s302_s14 = int_to_ptr.vmem [resolvable:$true] %s301_s14 }
  0x33   :  { %353 = vmatpush3.msra.mxu0 %v93_v0  ;;  %388 = vmatpush3.msra.mxu1 %v214_v1  ;;  %v212_v5 = vld [vmem:[#allocation9 + $0x68] sm:$0xff]  ;;  %v90_v6 = vld [vmem:[#allocation6 + $0x60] sm:$0xff]  ;;  %v211_v7 = vld [vmem:[#allocation9 + $0x60] sm:$0xff]  ;;  %s509_s15 = scalar_lea.vmem %s302_s14, 256  ;;  %p514_p7 = scmp.lt.s32.totalorder %s302_s14, %s302_s14 }
  0x34   :  { %354 = vmatprep.subr.mxu0 %v92_v2  ;;  %389 = vmatprep.subr.mxu1 %v213_v3  ;;  %v89_v8 = vld [vmem:[#allocation6 + $0x58] sm:$0xff]  ;;  %v210_v9 = vld [vmem:[#allocation9 + $0x58] sm:$0xff]  ;;  %v88_v10 = vld [vmem:[#allocation6 + $0x50] sm:$0xff]  ;;  %p510_p6 = scmp.ne.s32.totalorder %s302_s14, %s509_s15  ;;  %p515_p8 = scmp.lt.s32.totalorder %s509_s15, %s509_s15 }
  0x35   :  { %355 = vmatpush3.msra.mxu0 %v92_v2  ;;  %390 = vmatpush3.msra.mxu1 %v213_v3  ;;  %v209_v11 = vld [vmem:[#allocation9 + $0x50] sm:$0xff]  ;;  %v87_v12 = vld [vmem:[#allocation6 + $0x48] sm:$0xff]  ;;  %v208_v13 = vld [vmem:[#allocation9 + $0x48] sm:$0xff] }
  0x36   :  { %356 = vmatprep.subr.mxu0 %v91_v4  ;;  %391 = vmatprep.subr.mxu1 %v212_v5  ;;  %v86_v14 = vld [vmem:[#allocation6 + $0x40] sm:$0xff]  ;;  %v207_v15 = vld [vmem:[#allocation9 + $0x40] sm:$0xff]  ;;  %v85_v16 = vld [vmem:[#allocation6 + $0x38] sm:$0xff]  ;;  %p516_p9 = por %p515_p8, %p514_p7 }
  0x37   :  { %357 = vmatpush3.msra.mxu0 %v91_v4  ;;  %392 = vmatpush3.msra.mxu1 %v212_v5  ;;  %v206_v17 = vld [vmem:[#allocation9 + $0x38] sm:$0xff]  ;;  %v84_v18 = vld [vmem:[#allocation6 + $0x30] sm:$0xff]  ;;  %v205_v19 = vld [vmem:[#allocation9 + $0x30] sm:$0xff] }
  0x38   :  { %358 = vmatprep.subr.mxu0 %v90_v6  ;;  %393 = vmatprep.subr.mxu1 %v211_v7  ;;  %v83_v20 = vld [vmem:[#allocation6 + $0x28] sm:$0xff]  ;;  %v204_v21 = vld [vmem:[#allocation9 + $0x28] sm:$0xff]  ;;  %v82_v22 = vld [vmem:[#allocation6 + $0x20] sm:$0xff]  ;;  %p517_p10 = pnand %p516_p9, %p510_p6 }
  0x39   :  { %359 = vmatpush3.msra.mxu0 %v90_v6  ;;  %394 = vmatpush3.msra.mxu1 %v211_v7  ;;  %v203_v23 = vld [vmem:[#allocation9 + $0x20] sm:$0xff]  ;;  %v81_v24 = vld [vmem:[#allocation6 + $0x18] sm:$0xff]  ;;  %v202_v25 = vld [vmem:[#allocation9 + $0x18] sm:$0xff] }
  0x3a   :  { %360 = vmatprep.subr.mxu0 %v89_v8  ;;  %395 = vmatprep.subr.mxu1 %v210_v9  ;;  %v80_v26 = vld [vmem:[#allocation6 + $0x10] sm:$0xff]  ;;  %v201_v27 = vld [vmem:[#allocation9 + $0x10] sm:$0xff]  ;;  %v79_v28 = vld [vmem:[#allocation6 + $0x8] sm:$0xff] }
  0x3b   :  { %361 = vmatpush3.msra.mxu0 %v89_v8  ;;  %396 = vmatpush3.msra.mxu1 %v210_v9  ;;  %v200_v29 = vld [vmem:[#allocation9 + $0x8] sm:$0xff]  ;;  %v78_v30 = vld [vmem:[#allocation6] sm:$0xff]  ;;  %v199_v31 = vld [vmem:[#allocation9] sm:$0xff] }
  0x3c   :  { %362 = vmatprep.subr.mxu0 %v88_v10  ;;  %397 = vmatprep.subr.mxu1 %v209_v11  ;;  %v76_v32 = vld [vmem:[#allocation3] sm:$0xff]  ;;  %v197_v33 = vld [vmem:[#allocation8] sm:$0xff]  ;;  %v77_v34 = vld [vmem:[#allocation3 + $0x8] sm:$0xff] }
  0x3d   :  { %363 = vmatpush3.msra.mxu0 %v88_v10  ;;  %398 = vmatpush3.msra.mxu1 %v209_v11  ;;  %v198_v35 = vld [vmem:[#allocation8 + $0x8] sm:$0xff]  ;;  %v315_v36 = vld [vmem:[%s609_s2] ss:$0 sm:$0xff] }
  0x3e   :  { %364 = vmatprep.subr.mxu0 %v87_v12  ;;  %399 = vmatprep.subr.mxu1 %v208_v13 }
  0x3f   :  { %365 = vmatpush3.msra.mxu0 %v87_v12  ;;  %400 = vmatpush3.msra.mxu1 %v208_v13 }
  0x40   :  { %366 = vmatprep.subr.mxu0 %v86_v14  ;;  %401 = vmatprep.subr.mxu1 %v207_v15 }
  0x41   :  { %367 = vmatpush3.msra.mxu0 %v86_v14  ;;  %402 = vmatpush3.msra.mxu1 %v207_v15 }
  0x42   :  { %368 = vmatprep.subr.mxu0 %v85_v16  ;;  %403 = vmatprep.subr.mxu1 %v206_v17 }
  0x43   :  { %369 = vmatpush3.msra.mxu0 %v85_v16  ;;  %404 = vmatpush3.msra.mxu1 %v206_v17 }
  0x44   :  { %370 = vmatprep.subr.mxu0 %v84_v18  ;;  %405 = vmatprep.subr.mxu1 %v205_v19 }
  0x45   :  { %371 = vmatpush3.msra.mxu0 %v84_v18  ;;  %406 = vmatpush3.msra.mxu1 %v205_v19 }
  0x46   :  { %372 = vmatprep.subr.mxu0 %v83_v20  ;;  %407 = vmatprep.subr.mxu1 %v204_v21 }
  0x47   :  { %373 = vmatpush3.msra.mxu0 %v83_v20  ;;  %408 = vmatpush3.msra.mxu1 %v204_v21 }
  0x48   :  { %374 = vmatprep.subr.mxu0 %v82_v22  ;;  %409 = vmatprep.subr.mxu1 %v203_v23 }
  0x49   :  { %375 = vmatpush3.msra.mxu0 %v82_v22  ;;  %410 = vmatpush3.msra.mxu1 %v203_v23 }
  0x4a   :  { %376 = vmatprep.subr.mxu0 %v81_v24  ;;  %411 = vmatprep.subr.mxu1 %v202_v25 }
  0x4b   :  { %377 = vmatpush3.msra.mxu0 %v81_v24  ;;  %412 = vmatpush3.msra.mxu1 %v202_v25 }
  0x4c   :  { %378 = vmatprep.subr.mxu0 %v80_v26  ;;  %413 = vmatprep.subr.mxu1 %v201_v27 }
  0x4d   :  { %379 = vmatpush3.msra.mxu0 %v80_v26  ;;  %414 = vmatpush3.msra.mxu1 %v201_v27 }
  0x4e   :  { %380 = vmatprep.subr.mxu0 %v79_v28  ;;  %415 = vmatprep.subr.mxu1 %v200_v29 }
  0x4f   :  { %381 = vmatpush3.msra.mxu0 %v79_v28  ;;  %416 = vmatpush3.msra.mxu1 %v200_v29 }
  0x50   :  { %382 = vmatprep.subr.mxu0 %v78_v30  ;;  %417 = vmatprep.subr.mxu1 %v199_v31 }
  0x51   :  { %383 = vmatpush3.msra.mxu0 %v78_v30  ;;  %384 = vmatprep.mubr.f32.mxu0 %v76_v32 }
  0x52   :  { %418 = vmatpush3.msra.mxu1 %v199_v31  ;;  %419 = vmatprep.mubr.f32.mxu1 %v197_v33 }
  0x53   :  { %385 = vmatmul.mubr.f32.vlgmr.msra.gmra.mxu0 %v77_v34  ;;  %420 = vmatmul.mubr.f32.vlgmr.msra.gmra.mxu1 %v198_v35 }
 0x113   :  { %v386_v37 = vpop.f32.mrf.mxu0  ;;  %v421_v38 = vpop.f32.mrf.mxu1 }
 0x114   :  { %v181_v39 = vadd.f32 %v386_v37, %v315_v36 }
 0x115   :  { %v160_v40 = vpop.f32.mrf.mxu0  ;;  %v281_v43 = vpop.f32.mrf.mxu1 }
 0x116   :  { %v293_v41 = vadd.f32 %v421_v38, %v181_v39  ;;  %v180_v42 = vadd.f32 %v315_v36, %v160_v40 }
 0x118   :  { %295 = vst [vmem:[#allocation11 + $0x8] sm:$0xff] %v293_v41  ;;  %v292_v44 = vadd.f32 %v281_v43, %v180_v42 }
 0x11a   :  { %294 = vst [vmem:[#allocation11] sm:$0xff] %v292_v44 }
 0x11b   :  { %520 = shalt.err (!%p517_p10)
}
 0x11c   :  { %307 = dma.vmem_to_hbm [thread:$0]  %s302_s14, 256, %s612_s5, [#allocation5], %s539_s23, %s539_s23, %s540_s24  }
 0x11d   :  { %535 = dma.done.wait [#allocation5], 256  }
 0x11e   :  { %536 = vsyncadd [#allocation5], 4294967040 }
 0x11f   :  { %311 = vsyncpa [#allocation4], 1 }
 0x120   :  { %312 = vsyncpa [#allocation7], 1 }
 0x121   :  { %313 = vsyncpa [#allocation10], 1 }
 0x122   :  { %314 = vsyncpa [#allocation5], 1 }

</bundles_post_ra>
